<compile_context>
chip_gen: v7x
topology: tpu7x:2x2x1
jax: 0.10.0
libtpu: 0.0.40
codegen_flags: <defaults>
</compile_context>

<pallas_src>
import jax
import jax.numpy as jnp
from jax import lax
from jax.experimental import pallas as pl
from jax.experimental.pallas import tpu as pltpu

LAYER_NUM = 3
CATE_DIM = 10
BT_MAX = 1024  # max batch tile (lanes); sweepable per chip generation


def _round_up(a, m):
    return ((a + m - 1) // m) * m


def make_dcn_kernel(n_cate, n_num_pad, layer_num, v_pads):
    """Kernel closure over static feature counts (feature-major layout)."""
    k_emb = sum(v_pads)
    offs = []
    o = 0
    for v in v_pads:
        offs.append(o)
        o += v

    def kernel(xt_ref,    # (F_pad, Bt)  f32: rows [0,n_cate)=indices, rest=numerics
               gw_ref,    # (D, K_tot)   block-diag embedding + identity gather matrix
               cw_ref,    # (D, L)       cross kernels (column i = kernels[i])
               dw_ref,    # (L, D, D)    deep weights, already transposed (W_i^T)
               db_ref,    # (D, L)       deep biases (column i)
               hwc_ref,   # (T_pad, D)   head weights, cross half (transposed)
               hwd_ref,   # (T_pad, D)   head weights, deep half  (transposed)
               hb_ref,    # (T_pad, 1)   head bias
               out_ref):  # (T_pad, Bt)
        bt = xt_ref.shape[1]
        xt = xt_ref[...]
        idx = xt[:n_cate, :].astype(jnp.int32)          # (n_cate, Bt)
        xnum = xt[n_cate:n_cate + n_num_pad, :]         # (n_num_pad, Bt)

        # --- Fused gather: combined one-hot against one shared iota ---
        iota = lax.broadcasted_iota(jnp.int32, (k_emb, bt), 0)
        onehot = (iota == (idx[0:1, :] + offs[0])).astype(jnp.float32)
        for i in range(1, n_cate):
            onehot = onehot + (iota == (idx[i:i + 1, :] + offs[i])).astype(jnp.float32)
        rhs = jnp.concatenate([onehot, xnum], axis=0)    # (K_tot, Bt), 8-aligned concat
        x0 = jnp.dot(gw_ref[...], rhs,
                     preferred_element_type=jnp.float32)  # (D, Bt)

        # --- Cross network: x_{i+1} = x0 * (w_i . x_i) + x_i (no bias) ---
        xc = x0
        for i in range(layer_num):
            w = cw_ref[:, i:i + 1]                                  # (D, 1)
            xw = jnp.sum(xc * w, axis=0, keepdims=True)             # (1, Bt)
            xc = x0 * xw + xc

        # --- Deep network: x_{i+1} = relu(W_i^T @ x_i + b_i) ---
        xd = x0
        for i in range(layer_num):
            xd = jnp.maximum(
                jnp.dot(dw_ref[i], xd, preferred_element_type=jnp.float32)
                + db_ref[:, i:i + 1], 0.0)

        # --- Heads: two dots summed (cross half + deep half) + bias ---
        out = jnp.dot(hwc_ref[...], xc, preferred_element_type=jnp.float32)
        out = out + jnp.dot(hwd_ref[...], xd, preferred_element_type=jnp.float32)
        out_ref[...] = out + hb_ref[...]

    return kernel


def dcn1_forward(x, params, in_dim_cate, in_dim_num, out_dim_cate, out_dim_num,
                 layer_num=LAYER_NUM, bt_max=BT_MAX):
    n_cate = len(in_dim_cate)
    n_num = in_dim_num
    B = x.shape[0]
    D = n_cate * CATE_DIM + n_num
    T = sum(out_dim_cate) + out_dim_num
    T_pad = _round_up(T, 8)
    n_num_pad = _round_up(n_num, 8)

    # --- Block-diagonal gather matrix (D, K_tot), built once ---
    v_pads = [_round_up(v, 8) for v in in_dim_cate]
    k_emb = sum(v_pads)
    k_tot = k_emb + n_num_pad
    gw = jnp.zeros((D, k_tot), jnp.float32)
    col = 0
    for i in range(n_cate):
        tbl = params["embeds"][i].astype(jnp.float32)            # (V_i, CATE_DIM)
        gw = gw.at[i * CATE_DIM:(i + 1) * CATE_DIM,
                   col:col + tbl.shape[0]].set(tbl.T)
        col += v_pads[i]
    gw = gw.at[n_cate * CATE_DIM:,
               k_emb:k_emb + n_num].set(jnp.eye(n_num, dtype=jnp.float32))

    # --- Feature-major (transposed) weights ---
    cross_w_t = params["cross_w"].astype(jnp.float32).T                         # (D, L)
    deep_w_t = jnp.transpose(params["deep_w"].astype(jnp.float32), (0, 2, 1))   # (L, D, D)
    deep_b_t = params["deep_b"].astype(jnp.float32).T                           # (D, L)
    head_w = params["head_w"].astype(jnp.float32)                               # (2D, T)
    head_b = params["head_b"].astype(jnp.float32)                               # (1, T)
    hw_t = jnp.pad(head_w.T, ((0, T_pad - T), (0, 0)))                          # (T_pad, 2D)
    hb_t = jnp.pad(head_b.T, ((0, T_pad - T), (0, 0)))                          # (T_pad, 1)
    hwc = hw_t[:, :D]
    hwd = hw_t[:, D:]

    # --- Batch tiling: big lane tile, >=2 grid steps when B is large enough ---
    bt = min(bt_max, _round_up(B, 128))
    if B >= 256 and -(-B // bt) < 2:          # keep both v7x TensorCores busy
        bt = _round_up(-(-B // 2), 128)
    b_pad = _round_up(B, bt)
    grid = (b_pad // bt,)

    # --- Single feature-major input tensor (F_pad, b_pad) ---
    xt = x.astype(jnp.float32).T                                   # (F, B)
    xt = jnp.pad(xt, ((0, n_num_pad - n_num), (0, b_pad - B)))     # (F_pad, b_pad)
    F_pad = n_cate + n_num_pad

    kernel = make_dcn_kernel(n_cate, n_num_pad, layer_num, v_pads)

    in_specs = [
        pl.BlockSpec((F_pad, bt), lambda b: (0, b)),               # batch-tiled input
        pl.BlockSpec(gw.shape, lambda b: (0, 0)),                  # weights: resident
        pl.BlockSpec(cross_w_t.shape, lambda b: (0, 0)),
        pl.BlockSpec(deep_w_t.shape, lambda b: (0, 0, 0)),
        pl.BlockSpec(deep_b_t.shape, lambda b: (0, 0)),
        pl.BlockSpec(hwc.shape, lambda b: (0, 0)),
        pl.BlockSpec(hwd.shape, lambda b: (0, 0)),
        pl.BlockSpec(hb_t.shape, lambda b: (0, 0)),
    ]
    out_spec = pl.BlockSpec((T_pad, bt), lambda b: (0, b))

    out = pl.pallas_call(
        kernel,
        out_shape=jax.ShapeDtypeStruct((T_pad, b_pad), jnp.float32),
        grid=grid,
        in_specs=in_specs,
        out_specs=out_spec,
        compiler_params=pltpu.CompilerParams(
            dimension_semantics=("parallel",),
            vmem_limit_bytes=32 * 1024 * 1024),
    )(xt, gw, cross_w_t, deep_w_t, deep_b_t, hwc, hwd, hb_t)

    out = out[:T, :B].T                                            # (B, T)

    # Split concatenated head output into the tuple DCN1.forward returns.
    arr = []
    off = 0
    for d in out_dim_cate:
        arr.append(out[:, off:off + d])
        off += d
    for _ in range(out_dim_num):
        arr.append(out[:, off:off + 1])
        off += 1
    return tuple(arr)


if __name__ == "__main__":
    # Small, self-consistent configuration.
    in_dim_cate = [7, 5]          # vocab sizes of the two categorical features
    in_dim_num = 12               # number of numeric features
    out_dim_cate = [3, 4]         # classifier head sizes
    out_dim_num = 2               # number of regressor heads
    B = 8
    D = len(in_dim_cate) * CATE_DIM + in_dim_num        # 32
    T = sum(out_dim_cate) + out_dim_num                 # 9

    key = jax.random.PRNGKey(0)
    keys = jax.random.split(key, 12)

    params = {
        "embeds": [
            jax.random.normal(keys[i], (in_dim_cate[i], CATE_DIM), jnp.float32)
            for i in range(len(in_dim_cate))
        ],
        # xavier_normal_ on (D, 1): std = sqrt(2 / (D + 1))
        "cross_w": (jax.random.normal(keys[4], (LAYER_NUM, D), jnp.float32)
                    * jnp.sqrt(2.0 / (D + 1))),
        "deep_w": (jax.random.normal(keys[5], (LAYER_NUM, D, D), jnp.float32)
                   * jnp.sqrt(1.0 / D)),
        "deep_b": (jax.random.normal(keys[6], (LAYER_NUM, D), jnp.float32) * 0.01),
        "head_w": (jax.random.normal(keys[7], (2 * D, T), jnp.float32)
                   * jnp.sqrt(1.0 / (2 * D))),
        "head_b": (jax.random.normal(keys[8], (1, T), jnp.float32) * 0.01),
    }

    # --- Pure-JAX reference of the full forward (matches PyTorch DCN1) ---
    def ref_forward(x_in):
        parts = []
        for i in range(len(in_dim_cate)):
            parts.append(jnp.take(params["embeds"][i],
                                  x_in[:, i].astype(jnp.int32), axis=0))
        parts.append(x_in[:, len(in_dim_cate):])
        x0 = jnp.concatenate(parts, axis=1)
        xc = x0
        for i in range(LAYER_NUM):
            xw = xc @ params["cross_w"][i][:, None]     # uses CURRENT x, as in PyTorch
            xc = x0 * xw + xc
        xd = x0
        for i in range(LAYER_NUM):
            xd = jnp.maximum(xd @ params["deep_w"][i] + params["deep_b"][i], 0.0)
        feat = jnp.concatenate([xc, xd], axis=1)
        return feat @ params["head_w"] + params["head_b"]

    # Input: first len(in_dim_cate) columns are category indices (stored as
    # floats, like the PyTorch module expects), remaining columns are numeric.
    idx0 = jax.random.randint(keys[9], (B, 1), 0, in_dim_cate[0]).astype(jnp.float32)
    idx1 = jax.random.randint(keys[10], (B, 1), 0, in_dim_cate[1]).astype(jnp.float32)
    num = jax.random.normal(keys[11], (B, in_dim_num), jnp.float32)
    x = jnp.concatenate([idx0, idx1, num], axis=1)      # (B, 14)

    outs = dcn1_forward(x, params, in_dim_cate, in_dim_num,
                        out_dim_cate, out_dim_num)
    jax.block_until_ready(outs)

    got = jnp.concatenate(outs, axis=1)
    ref = ref_forward(x)
    assert jnp.allclose(got, ref, atol=1e-3, rtol=1e-3), "mismatch vs reference (B=8)"

    # sanity on shapes
    assert outs[0].shape == (B, out_dim_cate[0])
    assert outs[1].shape == (B, out_dim_cate[1])
    assert outs[2].shape == (B, 1) and outs[3].shape == (B, 1)

    # --- Second check: batch that exercises multi-step grid + batch padding ---
    B2 = 300
    k2 = jax.random.split(keys[11], 4)
    idx0b = jax.random.randint(k2[0], (B2, 1), 0, in_dim_cate[0]).astype(jnp.float32)
    idx1b = jax.random.randint(k2[1], (B2, 1), 0, in_dim_cate[1]).astype(jnp.float32)
    numb = jax.random.normal(k2[2], (B2, in_dim_num), jnp.float32)
    x2 = jnp.concatenate([idx0b, idx1b, numb], axis=1)
    outs2 = dcn1_forward(x2, params, in_dim_cate, in_dim_num,
                         out_dim_cate, out_dim_num)
    jax.block_until_ready(outs2)
    got2 = jnp.concatenate(outs2, axis=1)
    ref2 = ref_forward(x2)
    assert jnp.allclose(got2, ref2, atol=1e-3, rtol=1e-3), "mismatch vs reference (B=300)"
    assert outs2[0].shape == (B2, out_dim_cate[0])

    print("KERNEL_OK")
</pallas_src>

<mosaic_0001>
module attributes {stable_mosaic.version = 11 : i64} {
  func.func @kernel(%arg0: i32, %arg1: memref<18x128xf32, #tpu.memory_space<vmem>>, %arg2: memref<32x32xf32, #tpu.memory_space<vmem>>, %arg3: memref<32x3xf32, #tpu.memory_space<vmem>>, %arg4: memref<3x32x32xf32, #tpu.memory_space<vmem>>, %arg5: memref<32x3xf32, #tpu.memory_space<vmem>>, %arg6: memref<16x32xf32, #tpu.memory_space<vmem>>, %arg7: memref<16x32xf32, #tpu.memory_space<vmem>>, %arg8: memref<16x1xf32, #tpu.memory_space<vmem>>, %arg9: memref<16x128xf32, #tpu.memory_space<vmem>>) attributes {dimension_semantics = [#tpu.dimension_semantics<parallel>], iteration_bounds = array<i64: 1>, scalar_prefetch = 0 : i64, scratch_operands = 0 : i64, tpu.core_type = #tpu.core_type<tc>, window_params = [{transform_indices = @transform_0, window_bounds = array<i64: 18, 128>}, {pipeline_mode = #tpu.pipeline_mode<synchronous>, transform_indices = @transform_1, window_bounds = array<i64: 32, 32>}, {pipeline_mode = #tpu.pipeline_mode<synchronous>, transform_indices = @transform_2, window_bounds = array<i64: 32, 3>}, {pipeline_mode = #tpu.pipeline_mode<synchronous>, transform_indices = @transform_3, window_bounds = array<i64: 3, 32, 32>}, {pipeline_mode = #tpu.pipeline_mode<synchronous>, transform_indices = @transform_4, window_bounds = array<i64: 32, 3>}, {pipeline_mode = #tpu.pipeline_mode<synchronous>, transform_indices = @transform_5, window_bounds = array<i64: 16, 32>}, {pipeline_mode = #tpu.pipeline_mode<synchronous>, transform_indices = @transform_6, window_bounds = array<i64: 16, 32>}, {pipeline_mode = #tpu.pipeline_mode<synchronous>, transform_indices = @transform_7, window_bounds = array<i64: 16, 1>}, {transform_indices = @transform_8, window_bounds = array<i64: 16, 128>}]} {
    %c0 = arith.constant 0 : index
    %c0_0 = arith.constant 0 : index
    %0 = vector.load %arg1[%c0, %c0_0] : memref<18x128xf32, #tpu.memory_space<vmem>>, vector<18x128xf32>
    %1 = vector.extract_strided_slice %0 {offsets = [0, 0], sizes = [2, 128], strides = [1, 1]} : vector<18x128xf32> to vector<2x128xf32>
    %2 = arith.fptosi %1 : vector<2x128xf32> to vector<2x128xi32>
    %3 = vector.extract_strided_slice %0 {offsets = [2, 0], sizes = [16, 128], strides = [1, 1]} : vector<18x128xf32> to vector<16x128xf32>
    %4 = tpu.iota {dimensions = array<i32: 0>} : vector<16x128xi32>
    %5 = vector.extract_strided_slice %2 {offsets = [0, 0], sizes = [1, 128], strides = [1, 1]} : vector<2x128xi32> to vector<1x128xi32>
    %c0_i32 = arith.constant 0 : i32
    %6 = vector.broadcast %c0_i32 : i32 to vector<1x128xi32>
    %7 = arith.addi %5, %6 : vector<1x128xi32>
    %8 = vector.broadcast %7 : vector<1x128xi32> to vector<16x128xi32>
    %9 = arith.cmpi eq, %4, %8 : vector<16x128xi32>
    %10 = arith.extui %9 : vector<16x128xi1> to vector<16x128xi32>
    %11 = arith.sitofp %10 : vector<16x128xi32> to vector<16x128xf32>
    %12 = vector.extract_strided_slice %2 {offsets = [1, 0], sizes = [1, 128], strides = [1, 1]} : vector<2x128xi32> to vector<1x128xi32>
    %c8_i32 = arith.constant 8 : i32
    %13 = vector.broadcast %c8_i32 : i32 to vector<1x128xi32>
    %14 = arith.addi %12, %13 : vector<1x128xi32>
    %15 = vector.broadcast %14 : vector<1x128xi32> to vector<16x128xi32>
    %16 = arith.cmpi eq, %4, %15 : vector<16x128xi32>
    %17 = arith.extui %16 : vector<16x128xi1> to vector<16x128xi32>
    %18 = arith.sitofp %17 : vector<16x128xi32> to vector<16x128xf32>
    %19 = arith.addf %11, %18 : vector<16x128xf32>
    %20 = tpu.concatenate %19, %3 in 0 : vector<16x128xf32>, vector<16x128xf32> -> vector<32x128xf32>
    %c0_1 = arith.constant 0 : index
    %c0_2 = arith.constant 0 : index
    %21 = vector.load %arg2[%c0_1, %c0_2] : memref<32x32xf32, #tpu.memory_space<vmem>>, vector<32x32xf32>
    %cst = arith.constant dense<0.000000e+00> : vector<32x128xf32>
    %22 = tpu.matmul %21, %20, %cst {dimension_numbers = #tpu.dot_dimension_numbers<[1], [0], [0], [1], [0, 0, 1, 1], [], []>} : vector<32x32xf32>, vector<32x128xf32>, vector<32x128xf32> -> vector<32x128xf32>
    %c0_3 = arith.constant 0 : index
    %c0_4 = arith.constant 0 : index
    %23 = vector.load %arg3[%c0_3, %c0_4] : memref<32x3xf32, #tpu.memory_space<vmem>>, vector<32x1xf32>
    %24 = vector.broadcast %23 : vector<32x1xf32> to vector<32x128xf32>
    %25 = arith.mulf %22, %24 : vector<32x128xf32>
    %cst_5 = arith.constant dense<0.000000e+00> : vector<128xf32>
    %26 = vector.multi_reduction <add>, %25, %cst_5 [0] : vector<32x128xf32> to vector<128xf32>
    %27 = vector.shape_cast %26 : vector<128xf32> to vector<1x128xf32>
    %28 = vector.broadcast %27 : vector<1x128xf32> to vector<32x128xf32>
    %29 = arith.mulf %22, %28 : vector<32x128xf32>
    %30 = arith.addf %29, %22 : vector<32x128xf32>
    %c0_6 = arith.constant 0 : index
    %c1 = arith.constant 1 : index
    %31 = vector.load %arg3[%c0_6, %c1] : memref<32x3xf32, #tpu.memory_space<vmem>>, vector<32x1xf32>
    %32 = vector.broadcast %31 : vector<32x1xf32> to vector<32x128xf32>
    %33 = arith.mulf %30, %32 : vector<32x128xf32>
    %cst_7 = arith.constant dense<0.000000e+00> : vector<128xf32>
    %34 = vector.multi_reduction <add>, %33, %cst_7 [0] : vector<32x128xf32> to vector<128xf32>
    %35 = vector.shape_cast %34 : vector<128xf32> to vector<1x128xf32>
    %36 = vector.broadcast %35 : vector<1x128xf32> to vector<32x128xf32>
    %37 = arith.mulf %22, %36 : vector<32x128xf32>
    %38 = arith.addf %37, %30 : vector<32x128xf32>
    %c0_8 = arith.constant 0 : index
    %c2 = arith.constant 2 : index
    %39 = vector.load %arg3[%c0_8, %c2] : memref<32x3xf32, #tpu.memory_space<vmem>>, vector<32x1xf32>
    %40 = vector.broadcast %39 : vector<32x1xf32> to vector<32x128xf32>
    %41 = arith.mulf %38, %40 : vector<32x128xf32>
    %cst_9 = arith.constant dense<0.000000e+00> : vector<128xf32>
    %42 = vector.multi_reduction <add>, %41, %cst_9 [0] : vector<32x128xf32> to vector<128xf32>
    %43 = vector.shape_cast %42 : vector<128xf32> to vector<1x128xf32>
    %44 = vector.broadcast %43 : vector<1x128xf32> to vector<32x128xf32>
    %45 = arith.mulf %22, %44 : vector<32x128xf32>
    %46 = arith.addf %45, %38 : vector<32x128xf32>
    %c0_10 = arith.constant 0 : index
    %c0_11 = arith.constant 0 : index
    %c0_12 = arith.constant 0 : index
    %47 = vector.load %arg4[%c0_10, %c0_11, %c0_12] : memref<3x32x32xf32, #tpu.memory_space<vmem>>, vector<1x32x32xf32>
    %48 = vector.shape_cast %47 : vector<1x32x32xf32> to vector<32x32xf32>
    %cst_13 = arith.constant dense<0.000000e+00> : vector<32x128xf32>
    %49 = tpu.matmul %48, %22, %cst_13 {dimension_numbers = #tpu.dot_dimension_numbers<[1], [0], [0], [1], [0, 0, 1, 1], [], []>} : vector<32x32xf32>, vector<32x128xf32>, vector<32x128xf32> -> vector<32x128xf32>
    %c0_14 = arith.constant 0 : index
    %c0_15 = arith.constant 0 : index
    %50 = vector.load %arg5[%c0_14, %c0_15] : memref<32x3xf32, #tpu.memory_space<vmem>>, vector<32x1xf32>
    %51 = vector.broadcast %50 : vector<32x1xf32> to vector<32x128xf32>
    %52 = arith.addf %49, %51 : vector<32x128xf32>
    %cst_16 = arith.constant 0.000000e+00 : f32
    %53 = vector.broadcast %cst_16 : f32 to vector<32x128xf32>
    %54 = arith.maximumf %52, %53 : vector<32x128xf32>
    %c1_17 = arith.constant 1 : index
    %c0_18 = arith.constant 0 : index
    %c0_19 = arith.constant 0 : index
    %55 = vector.load %arg4[%c1_17, %c0_18, %c0_19] : memref<3x32x32xf32, #tpu.memory_space<vmem>>, vector<1x32x32xf32>
    %56 = vector.shape_cast %55 : vector<1x32x32xf32> to vector<32x32xf32>
    %cst_20 = arith.constant dense<0.000000e+00> : vector<32x128xf32>
    %57 = tpu.matmul %56, %54, %cst_20 {dimension_numbers = #tpu.dot_dimension_numbers<[1], [0], [0], [1], [0, 0, 1, 1], [], []>} : vector<32x32xf32>, vector<32x128xf32>, vector<32x128xf32> -> vector<32x128xf32>
    %c0_21 = arith.constant 0 : index
    %c1_22 = arith.constant 1 : index
    %58 = vector.load %arg5[%c0_21, %c1_22] : memref<32x3xf32, #tpu.memory_space<vmem>>, vector<32x1xf32>
    %59 = vector.broadcast %58 : vector<32x1xf32> to vector<32x128xf32>
    %60 = arith.addf %57, %59 : vector<32x128xf32>
    %cst_23 = arith.constant 0.000000e+00 : f32
    %61 = vector.broadcast %cst_23 : f32 to vector<32x128xf32>
    %62 = arith.maximumf %60, %61 : vector<32x128xf32>
    %c2_24 = arith.constant 2 : index
    %c0_25 = arith.constant 0 : index
    %c0_26 = arith.constant 0 : index
    %63 = vector.load %arg4[%c2_24, %c0_25, %c0_26] : memref<3x32x32xf32, #tpu.memory_space<vmem>>, vector<1x32x32xf32>
    %64 = vector.shape_cast %63 : vector<1x32x32xf32> to vector<32x32xf32>
    %cst_27 = arith.constant dense<0.000000e+00> : vector<32x128xf32>
    %65 = tpu.matmul %64, %62, %cst_27 {dimension_numbers = #tpu.dot_dimension_numbers<[1], [0], [0], [1], [0, 0, 1, 1], [], []>} : vector<32x32xf32>, vector<32x128xf32>, vector<32x128xf32> -> vector<32x128xf32>
    %c0_28 = arith.constant 0 : index
    %c2_29 = arith.constant 2 : index
    %66 = vector.load %arg5[%c0_28, %c2_29] : memref<32x3xf32, #tpu.memory_space<vmem>>, vector<32x1xf32>
    %67 = vector.broadcast %66 : vector<32x1xf32> to vector<32x128xf32>
    %68 = arith.addf %65, %67 : vector<32x128xf32>
    %cst_30 = arith.constant 0.000000e+00 : f32
    %69 = vector.broadcast %cst_30 : f32 to vector<32x128xf32>
    %70 = arith.maximumf %68, %69 : vector<32x128xf32>
    %c0_31 = arith.constant 0 : index
    %c0_32 = arith.constant 0 : index
    %71 = vector.load %arg6[%c0_31, %c0_32] : memref<16x32xf32, #tpu.memory_space<vmem>>, vector<16x32xf32>
    %cst_33 = arith.constant dense<0.000000e+00> : vector<16x128xf32>
    %72 = tpu.matmul %71, %46, %cst_33 {dimension_numbers = #tpu.dot_dimension_numbers<[1], [0], [0], [1], [0, 0, 1, 1], [], []>} : vector<16x32xf32>, vector<32x128xf32>, vector<16x128xf32> -> vector<16x128xf32>
    %c0_34 = arith.constant 0 : index
    %c0_35 = arith.constant 0 : index
    %73 = vector.load %arg7[%c0_34, %c0_35] : memref<16x32xf32, #tpu.memory_space<vmem>>, vector<16x32xf32>
    %cst_36 = arith.constant dense<0.000000e+00> : vector<16x128xf32>
    %74 = tpu.matmul %73, %70, %cst_36 {dimension_numbers = #tpu.dot_dimension_numbers<[1], [0], [0], [1], [0, 0, 1, 1], [], []>} : vector<16x32xf32>, vector<32x128xf32>, vector<16x128xf32> -> vector<16x128xf32>
    %75 = arith.addf %72, %74 : vector<16x128xf32>
    %c0_37 = arith.constant 0 : index
    %c0_38 = arith.constant 0 : index
    %76 = vector.load %arg8[%c0_37, %c0_38] : memref<16x1xf32, #tpu.memory_space<vmem>>, vector<16x1xf32>
    %77 = vector.broadcast %76 : vector<16x1xf32> to vector<16x128xf32>
    %78 = arith.addf %75, %77 : vector<16x128xf32>
    %c0_39 = arith.constant 0 : index
    %c0_40 = arith.constant 0 : index
    %79 = vector.load %arg9[%c0_39, %c0_40] : memref<16x128xf32, #tpu.memory_space<vmem>>, vector<16x128xf32>
    tpu.vector_store %arg9[%c0_39, %c0_40], %78 {strides = array<i32>} : memref<16x128xf32, #tpu.memory_space<vmem>>, vector<16x128xf32>,
    return
  }
  func.func @transform_0(%arg0: i32) -> (i32, i32) {
    %c0_i32 = arith.constant 0 : i32
    %c0_i32_0 = arith.constant 0 : i32
    return %c0_i32, %arg0 : i32, i32
  }
  func.func @transform_1(%arg0: i32) -> (i32, i32) {
    %c0_i32 = arith.constant 0 : i32
    %c0_i32_0 = arith.constant 0 : i32
    %c0_i32_1 = arith.constant 0 : i32
    return %c0_i32, %c0_i32_0 : i32, i32
  }
  func.func @transform_2(%arg0: i32) -> (i32, i32) {
    %c0_i32 = arith.constant 0 : i32
    %c0_i32_0 = arith.constant 0 : i32
    %c0_i32_1 = arith.constant 0 : i32
    return %c0_i32, %c0_i32_0 : i32, i32
  }
  func.func @transform_3(%arg0: i32) -> (i32, i32, i32) {
    %c0_i32 = arith.constant 0 : i32
    %c0_i32_0 = arith.constant 0 : i32
    %c0_i32_1 = arith.constant 0 : i32
    %c0_i32_2 = arith.constant 0 : i32
    return %c0_i32, %c0_i32_0, %c0_i32_1 : i32, i32, i32
  }
  func.func @transform_4(%arg0: i32) -> (i32, i32) {
    %c0_i32 = arith.constant 0 : i32
    %c0_i32_0 = arith.constant 0 : i32
    %c0_i32_1 = arith.constant 0 : i32
    return %c0_i32, %c0_i32_0 : i32, i32
  }
  func.func @transform_5(%arg0: i32) -> (i32, i32) {
    %c0_i32 = arith.constant 0 : i32
    %c0_i32_0 = arith.constant 0 : i32
    %c0_i32_1 = arith.constant 0 : i32
    return %c0_i32, %c0_i32_0 : i32, i32
  }
  func.func @transform_6(%arg0: i32) -> (i32, i32) {
    %c0_i32 = arith.constant 0 : i32
    %c0_i32_0 = arith.constant 0 : i32
    %c0_i32_1 = arith.constant 0 : i32
    return %c0_i32, %c0_i32_0 : i32, i32
  }
  func.func @transform_7(%arg0: i32) -> (i32, i32) {
    %c0_i32 = arith.constant 0 : i32
    %c0_i32_0 = arith.constant 0 : i32
    %c0_i32_1 = arith.constant 0 : i32
    return %c0_i32, %c0_i32_0 : i32, i32
  }
  func.func @transform_8(%arg0: i32) -> (i32, i32) {
    %c0_i32 = arith.constant 0 : i32
    %c0_i32_0 = arith.constant 0 : i32
    return %c0_i32, %arg0 : i32, i32
  }
}

</mosaic_0001>

<bundles_post_ra>
// kernel: tpu_custom_call.1
= control target key start
LH: loop header
LB: loop body
LE: loop exit
PB: predicated region body
PF: predicated region fallthrough
CT: control target
= control target key end

     0   :  { %13 = vsyncpa [#allocation3], 0  ;;  %s1581_s0 = inlined_call_operand.hbm [shape: f32[18,128], index: 0, kind: input, shape index: {}]   ;;  %s1582_s1 = inlined_call_operand.hbm [shape: f32[32,32], index: 1, kind: input, shape index: {}]   ;;  %s1583_s2 = inlined_call_operand.vmem [shape: f32[32,3], index: 2, kind: input, shape index: {}]   ;;  %s1584_s3 = inlined_call_operand.vmem [shape: f32[3,32,32], index: 3, kind: input, shape index: {}]   ;;  %s1585_s4 = inlined_call_operand.vmem [shape: f32[32,3], index: 4, kind: input, shape index: {}]   ;;  %s1586_s5 = inlined_call_operand.hbm [shape: f32[16,32], index: 5, kind: input, shape index: {}]   ;;  %s1587_s6 = inlined_call_operand.hbm [shape: f32[16,32], index: 6, kind: input, shape index: {}]   ;;  %s1588_s7 = inlined_call_operand.vmem [shape: f32[16,1], index: 7, kind: input, shape index: {}]   ;;  %s1589_s8 = inlined_call_operand.hbm [shape: f32[16,128], index: 8, kind: output, shape index: {}]  }
   0x1   :  { %14 = vsyncpa [#allocation6], 0 }
   0x2   :  { %15 = vsyncpa [#allocation9], 0 }
   0x3   :  { %16 = vsyncpa [#allocation4], 0  ;;  %s1268_s27 = smov [#allocation5]   ;;  %s1269_s29 = smov [#allocation2]  }
   0x4   :  { %s34_s28 = sshll.u32 %s1268_s27, 4  ;;  %s22_s30 = sshll.u32 %s1269_s29, 4  ;;  %s35_s28 = int_to_ptr.vmem [resolvable:$true] %s34_s28  ;;  %s1324_s30 = int_to_ptr.vmem [resolvable:$true] %s22_s30 }
   0x5   :  { %s1150_s11 = scalar_lea.hbm %s1582_s1, 512 }
   0x6   :  { %p1151_p0 = scmp.ne.s32.totalorder %s1582_s1, %s1150_s11  ;;  %p1154_p1 = scmp.lt.u32.totalorder %s1150_s11, %s1582_s1 }
   0x8   :  { %p1156_p2 = pnand %p1154_p1, %p1151_p0 }
   0xa   :  { %1159 = shalt.err (!%p1156_p2)
}
   0xb   :  { %s1160_s16 = scalar_lea.vmem %s35_s28, 512  ;;  %p1165_p4 = scmp.lt.s32.totalorder %s35_s28, %s35_s28 }
   0xc   :  { %p1161_p3 = scmp.ne.s32.totalorder %s35_s28, %s1160_s16  ;;  %p1166_p5 = scmp.lt.s32.totalorder %s1160_s16, %s1160_s16 }
   0xe   :  { %p1167_p6 = por %p1166_p5, %p1165_p4 }
  0x10   :  { %p1168_p7 = pnand %p1167_p6, %p1161_p3 }
  0x12   :  { %1171 = shalt.err (!%p1168_p7)
}
  0x13   :  { %s1270_s17 = smov 128   ;;  %s1271_s18 = smov 8  }
  0x14   :  { %40 = dma.hbm_to_vmem [thread:$0]  %s1582_s1, 512, %s35_s28, [#allocation6], %s1270_s17, %s1270_s17, %s1271_s18  }
  0x15   :  { %s1172_s23 = scalar_lea.hbm %s1581_s0, 384 }
  0x16   :  { %p1173_p8 = scmp.ne.s32.totalorder %s1581_s0, %s1172_s23  ;;  %p1176_p9 = scmp.lt.u32.totalorder %s1172_s23, %s1581_s0 }
  0x18   :  { %p1178_p10 = pnand %p1176_p9, %p1173_p8 }
  0x1a   :  { %1181 = shalt.err (!%p1178_p10)
}
  0x1b   :  { %s1182_s29 = scalar_lea.vmem %s1324_s30, 384  ;;  %p1187_p12 = scmp.lt.s32.totalorder %s1324_s30, %s1324_s30 }
  0x1c   :  { %p1183_p11 = scmp.ne.s32.totalorder %s1324_s30, %s1182_s29  ;;  %p1188_p13 = scmp.lt.s32.totalorder %s1182_s29, %s1182_s29 }
  0x1e   :  { %p1189_p0 = por %p1188_p13, %p1187_p12 }
  0x20   :  { %p1190_p1 = pnand %p1189_p0, %p1183_p11 }
  0x22   :  { %1193 = shalt.err (!%p1190_p1)
}
  0x23   :  { %28 = dma.hbm_to_vmem [thread:$0]  %s1581_s0, 384, %s1324_s30, [#allocation3], %s1270_s17, %s1270_s17, %s1271_s18  }
  0x24   :  { %s1272_s9 = smov [#allocation7]   ;;  %s1273_s11 = smov [#allocation8]  }
  0x25   :  { %s52_s10 = sshll.u32 %s1272_s9, 4  ;;  %s64_s12 = sshll.u32 %s1273_s11, 4  ;;  %s53_s10 = int_to_ptr.vmem [resolvable:$true] %s52_s10  ;;  %s1361_s12 = int_to_ptr.vmem [resolvable:$true] %s64_s12 }
  0x26   :  { %s1194_s15 = scalar_lea.hbm %s1586_s5, 256 }
  0x27   :  { %p1195_p2 = scmp.ne.s32.totalorder %s1586_s5, %s1194_s15  ;;  %p1198_p3 = scmp.lt.u32.totalorder %s1194_s15, %s1586_s5 }
  0x29   :  { %p1200_p4 = pnand %p1198_p3, %p1195_p2 }
  0x2b   :  { %1203 = shalt.err (!%p1200_p4)
}
  0x2c   :  { %s1204_s0 = scalar_lea.vmem %s53_s10, 256  ;;  %p1209_p6 = scmp.lt.s32.totalorder %s53_s10, %s53_s10 }
  0x2d   :  { %p1205_p5 = scmp.ne.s32.totalorder %s53_s10, %s1204_s0  ;;  %p1210_p7 = scmp.lt.s32.totalorder %s1204_s0, %s1204_s0 }
  0x2f   :  { %p1211_p8 = por %p1210_p7, %p1209_p6 }
  0x31   :  { %p1212_p9 = pnand %p1211_p8, %p1205_p5 }
  0x33   :  { %1215 = shalt.err (!%p1212_p9)
}
  0x34   :  { %58 = dma.hbm_to_vmem [thread:$0]  %s1586_s5, 256, %s53_s10, [#allocation6], %s1270_s17, %s1270_s17, %s1271_s18  }
  0x35   :  { %s1216_s25 = scalar_lea.hbm %s1587_s6, 256 }
  0x36   :  { %p1217_p10 = scmp.ne.s32.totalorder %s1587_s6, %s1216_s25  ;;  %p1220_p11 = scmp.lt.u32.totalorder %s1216_s25, %s1587_s6 }
  0x38   :  { %p1222_p12 = pnand %p1220_p11, %p1217_p10 }
  0x3a   :  { %1225 = shalt.err (!%p1222_p12)
}
  0x3b   :  { %s1226_s28 = scalar_lea.vmem %s1361_s12, 256  ;;  %p1231_p0 = scmp.lt.s32.totalorder %s1361_s12, %s1361_s12 }
  0x3c   :  { %p1227_p13 = scmp.ne.s32.totalorder %s1361_s12, %s1226_s28  ;;  %p1232_p1 = scmp.lt.s32.totalorder %s1226_s28, %s1226_s28 }
  0x3e   :  { %p1233_p2 = por %p1232_p1, %p1231_p0 }
  0x40   :  { %p1234_p3 = pnand %p1233_p2, %p1227_p13 }
  0x42   :  { %1237 = shalt.err (!%p1234_p3)
}
  0x43   :  { %70 = dma.hbm_to_vmem [thread:$0]  %s1587_s6, 256, %s1361_s12, [#allocation9], %s1270_s17, %s1270_s17, %s1271_s18  }
  0x44   :  { %1260 = dma.done.wait [#allocation3], 384  }
  0x45   :  { %1261 = vsyncadd [#allocation3], 4294966912 }
  0x46   :  { %1262 = dma.done.wait [#allocation6], 768  }
  0x47   :  { %1263 = vsyncadd [#allocation6], 4294966528 }
  0x48   :  { %1264 = dma.done.wait [#allocation9], 256  }
  0x49   :  { %1265 = vsyncadd [#allocation9], 4294967040  ;;  %v89_v0 = vlaneseq  ;;  %v1274_v1 = vmov 0   ;;  %vm130_vm0 = vcmask 261120   ;;  %v85_v3 = vld [vmem:[#allocation2] sm:$0xff]  ;;  %v126_v6 = vld [vmem:[#allocation5] sm:$0xff] }
  0x4a   :  { %1139 = vset.pattern.permute.xlu1 %v1274_v1  ;;  %1138 = vset.pattern.permute.xlu0 %v1274_v1  ;;  %v1125_v4 = vtrunc.f32 %v85_v3  ;;  %v1404_v7 = vld [vmem:[%s1585_s4 + $0x10] sm:$0xff]  ;;  %v86_v11 = vld [vmem:[#allocation2 + $0x8] sm:$0xff]  ;;  %v1410_v13 = vld [vmem:[%s1585_s4] sm:$0xff]  ;;  %v119_v18 = vrot.slane %v85_v3, 2  ;;  %vm118_vm3 = vcmask 1045504   ;;  %v1275_v22 = vmov 0.0  }
  0x4b   :  { %v90_v2 = vshrl.u32 %v89_v0, 7  ;;  %1005 = vmatprep.mubr.msk.f32.mxu0 %vm130_vm0, %v126_v6  ;;  %v87_v12 = vld [vmem:[#allocation2 + $0x10] sm:$0x3]  ;;  %367 = vperm.xlu1 %1139, %v1404_v7   ;;  %v1415_v14 = vld [vmem:[%s1585_s4 + $0x18] sm:$0xff]  ;;  %v1421_v17 = vld [vmem:[%s1585_s4 + $0x8] sm:$0xff]  ;;  %v120_v19 = vrot.slane %v86_v11, 2 }
  0x4c   :  { %v1126_v8 = vcvt.f32.s32 %v1125_v4  ;;  %357 = vperm.xlu0 %1138, %v1410_v13   ;;  %v122_v20 = vrot.slane %v87_v12, 2  ;;  %v1276_v31 = vmov 1   ;;  %v228_v34 = vld [vmem:[%s1583_s2] sm:$0xff]  ;;  %v229_v35 = vld [vmem:[%s1583_s2 + $0x8] sm:$0xff]  ;;  %v230_v38 = vld [vmem:[%s1583_s2 + $0x10] sm:$0xff]  ;;  %v1277_v41 = vmov 2  }
  0x4d   :  { %v94_v5 = vsub.s32 0, %v90_v2  ;;  %v91_v9 = vadd.s32 8, %v90_v2  ;;  %v105_v10 = vsub.s32 1, %v90_v2  ;;  %v121_v27 = vsel %vm118_vm3, %v119_v18, %v120_v19  ;;  %v127_v36 = vld [vmem:[#allocation5 + $0x8] sm:$0xff]  ;;  %v128_v37 = vld [vmem:[#allocation5 + $0x10] sm:$0xff]  ;;  %v129_v39 = vld [vmem:[#allocation5 + $0x18] sm:$0xff] }
  0x4e   :  { %v102_v16 = vadd.s32 8, %v1126_v8  ;;  %v123_v28 = vsel %vm118_vm3, %v120_v19, %v122_v20  ;;  %v231_v40 = vld [vmem:[%s1583_s2 + $0x18] sm:$0xff]  ;;  %v347_v42 = vld [vmem:[%s1584_s3] sm:$0xff]  ;;  %v348_v3 = vld [vmem:[%s1584_s3 + $0x8] sm:$0xff] }
  0x4f   :  { %v95_v15 = vrot.slane %v1126_v8, %v94_v5  ;;  %372 = vperm.xlu1 %1139, %v1415_v14   ;;  %v1079_v33 = vpack.c.bf16 %v123_v28, %v121_v27  ;;  %1019 = vmatprep.mubr.msk.f32.mxu1 %vm130_vm0, %v347_v42  ;;  %v349_v5 = vld [vmem:[%s1584_s3 + $0x10] sm:$0xff] }
  0x50   :  { %v106_v21 = vrot.slane %v102_v16, %v105_v10  ;;  %362 = vperm.xlu0 %1138, %v1421_v17  }
  0x51   :  { %vm96_vm1 = vcmp.eq.s32.totalorder %v90_v2, %v95_v15  ;;  %vm97_vm2 = vcmp.eq.s32.totalorder %v91_v9, %v95_v15 }
  0x52   :  { %v921_v23 = vsel %vm96_vm1, 1.0, %v1275_v22  ;;  %v922_v24 = vsel %vm97_vm2, 1.0, %v1275_v22  ;;  %vm107_vm4 = vcmp.eq.s32.totalorder %v90_v2, %v106_v21  ;;  %vm108_vm5 = vcmp.eq.s32.totalorder %v91_v9, %v106_v21 }
  0x53   :  { %v923_v25 = vsel %vm107_vm4, 1.0, %v1275_v22  ;;  %v924_v26 = vsel %vm108_vm5, 1.0, %v1275_v22  ;;  %1141 = vset.pattern.permute.xlu1 %v1276_v31 }
  0x54   :  { %v113_v29 = vadd.f32 %v923_v25, %v921_v23  ;;  %v114_v30 = vadd.f32 %v924_v26, %v922_v24  ;;  %486 = vperm.xlu1 %1141, %v1421_v17   ;;  %1140 = vset.pattern.permute.xlu0 %v1276_v31 }
  0x55   :  { %482 = vperm.xlu0 %1140, %v1410_v13  }
  0x56   :  { %v1075_v32 = vpack.c.bf16 %v114_v30, %v113_v29 }
  0x58   :  { %1076 = vmatprep.subr.bf16.mxu0 %v1075_v32  ;;  %490 = vperm.xlu1 %1141, %v1404_v7  }
  0x59   :  { %1078 = vmatpush3.bf16.msra.mxu0 %v1075_v32  ;;  %494 = vperm.xlu0 %1140, %v1415_v14  }
  0x5a   :  { %1080 = vmatprep.subr.bf16.mxu0 %v1079_v33 }
  0x5c   :  { %1142 = vset.pattern.permute.xlu1 %v1274_v1 }
  0x5d   :  { %1082 = vmatpush3.bf16.msra.mxu0 %v1079_v33  ;;  %234 = vperm.xlu1 %1142, %v228_v34  }
  0x5e   :  { %1143 = vset.pattern.permute.xlu0 %v1274_v1 }
  0x5f   :  { %239 = vperm.xlu0 %1143, %v229_v35  }
  0x60   :  { %1006 = vmatmul.mubr.msk.f32.vlgmr.msra.gmra.mrb[0].mxu0 %vm130_vm0, %v127_v36 }
  0x61   :  { %1008 = vmatprep.mubr.msk.f32.mxu0 %vm130_vm0, %v128_v37  ;;  %244 = vperm.xlu1 %1142, %v230_v38  }
  0x63   :  { %1144 = vset.pattern.permute.xlu0 %v1276_v31 }
  0x64   :  { %1009 = vmatmul.mubr.msk.f32.gmra.mrb[2].mxu0 %vm130_vm0, %v129_v39  ;;  %274 = vperm.xlu0 %1144, %v228_v34  }
  0x65   :  { %249 = vperm.xlu1 %1142, %v231_v40  }
  0x68   :  { %286 = vperm.xlu0 %1144, %v231_v40  }
  0x69   :  { %1145 = vset.pattern.permute.xlu1 %v1276_v31 }
  0x6a   :  { %278 = vperm.xlu1 %1145, %v229_v35  }
  0x6c   :  { %1147 = vset.pattern.permute.xlu0 %v1277_v41 }
  0x6d   :  { %315 = vperm.xlu0 %1147, %v229_v35  }
  0x6e   :  { %282 = vperm.xlu1 %1145, %v230_v38  }
  0x71   :  { %604 = vperm.xlu0 %1147, %v1410_v13  }
  0x72   :  { %1146 = vset.pattern.permute.xlu1 %v1277_v41 }
  0x73   :  { %311 = vperm.xlu1 %1146, %v228_v34  }
  0x75   :  { %612 = vperm.xlu0 %1147, %v1404_v7   ;;  %v350_v7 = vld [vmem:[%s1584_s3 + $0x18] sm:$0xff] }
  0x77   :  { %319 = vperm.xlu1 %1146, %v230_v38  }
  0x79   :  { %1148 = vset.pattern.permute.xlu0 %v1274_v1 }
  0x7b   :  { %323 = vperm.xlu1 %1146, %v231_v40  }
  0x7f   :  { %608 = vperm.xlu1 %1146, %v1421_v17  }
  0x83   :  { %616 = vperm.xlu1 %1146, %v1415_v14  }
  0x87   :  { %1149 = vset.pattern.permute.xlu1 %v1274_v1 }
  0xca   :  { %v1456_v43 = vpop.permute.xlu1 %367 }
  0xcb   :  { %v1458_v44 = vpop.permute.xlu0 %357 }
  0xce   :  { %v1460_v45 = vpop.permute.xlu1 %372 }
  0xcf   :  { %v1462_v46 = vpop.permute.xlu0 %362 }
  0xd3   :  { %v1464_v47 = vpop.permute.xlu1 %486 }
  0xd4   :  { %v1466_v48 = vpop.permute.xlu0 %482 }
  0xd7   :  { %v1468_v49 = vpop.permute.xlu1 %490 }
  0xd8   :  { %v1470_v50 = vpop.permute.xlu0 %494 }
  0xdc   :  { %v235_v51 = vpop.permute.xlu1 %234 }
  0xde   :  { %v240_v52 = vpop.permute.xlu0 %239 }
  0xe0   :  { %v245_v53 = vpop.permute.xlu1 %244 }
  0xe3   :  { %v275_v14 = vpop.permute.xlu0 %274 }
  0xe4   :  { %v250_v61 = vpop.permute.xlu1 %249 }
  0xe7   :  { %v287_v26 = vpop.permute.xlu0 %286 }
  0xe9   :  { %v279_v12 = vpop.permute.xlu1 %278 }
  0xed   :  { %v283_v23 = vpop.permute.xlu1 %282 }
  0xf2   :  { %v312_v35 = vpop.permute.xlu1 %311 }
  0xf6   :  { %v320_v39 = vpop.permute.xlu1 %319 }
 0x133   :  { %v1472_v54 = vpop.f32.mrb[0].mxu0 }
 0x134   :  { %v253_v55 = vmul.f32 %v1472_v54, %v240_v52  ;;  %v1475_v56 = vpop.f32.mrb[1].mxu0  ;;  %v316_v52 = vpop.permute.xlu0 %315 }
 0x135   :  { %v252_v57 = vmul.f32 %v235_v51, %v1475_v56  ;;  %v1083_v58 = vpack.c.bf16 %v1472_v54, %v1475_v56 }
 0x137   :  { %v256_v59 = vadd.f32 %v253_v55, %v252_v57  ;;  %v1480_v60 = vpop.f32.mrb[2].mxu0  ;;  %1084 = vmatprep.subr.bf16.mxu1 %v1083_v58 }
 0x138   :  { %v1482_v62 = vpop.f32.mrb[3].mxu0  ;;  %1086 = vmatpush3.bf16.msra.mxu1 %v1083_v58  ;;  %v255_v1 = vmul.f32 %v1480_v60, %v250_v61 }
 0x139   :  { %v254_v63 = vmul.f32 %v245_v53, %v1482_v62  ;;  %v1087_v0 = vpack.c.bf16 %v1480_v60, %v1482_v62 }
 0x13b   :  { %v257_v2 = vadd.f32 %v256_v59, %v254_v63  ;;  %1088 = vmatprep.subr.bf16.mxu1 %v1087_v0  ;;  %v324_v63 = vpop.permute.xlu1 %323 }
 0x13c   :  { %1090 = vmatpush3.bf16.msra.mxu1 %v1087_v0 }
 0x13d   :  { %v258_v4 = vadd.f32 %v257_v2, %v255_v1 }
 0x13f   :  { %v259_v6 = vrot.slane %v258_v4, 4  ;;  %1020 = vmatmul.mubr.msk.f32.vlgmr.msra.gmra.mrb[0].mxu1 %vm130_vm0, %v348_v3 }
 0x140   :  { %1022 = vmatprep.mubr.msk.f32.mxu1 %vm130_vm0, %v349_v5 }
 0x141   :  { %v260_v8 = vadd.f32 %v259_v6, %v258_v4 }
 0x143   :  { %1023 = vmatmul.mubr.msk.f32.gmra.mrb[2].mxu1 %vm130_vm0, %v350_v7  ;;  %v261_v9 = vrot.slane %v260_v8, 2 }
 0x145   :  { %v262_v10 = vadd.f32 %v261_v9, %v260_v8 }
 0x147   :  { %v263_v11 = vrot.slane %v262_v10, 1 }
 0x149   :  { %v264_v13 = vadd.f32 %v263_v11, %v262_v10 }
 0x14b   :  { %v265_v15 = vmul.f32 %v264_v13, %v1475_v56  ;;  %v266_v16 = vmul.f32 %v1472_v54, %v264_v13  ;;  %v268_v17 = vmul.f32 %v1480_v60, %v264_v13  ;;  %v267_v18 = vmul.f32 %v264_v13, %v1482_v62 }
 0x14d   :  { %v269_v19 = vadd.f32 %v265_v15, %v1475_v56  ;;  %v270_v20 = vadd.f32 %v1472_v54, %v266_v16  ;;  %v272_v21 = vadd.f32 %v1480_v60, %v268_v17  ;;  %v271_v22 = vadd.f32 %v267_v18, %v1482_v62 }
 0x14f   :  { %v289_v24 = vmul.f32 %v275_v14, %v269_v19  ;;  %v290_v25 = vmul.f32 %v279_v12, %v270_v20  ;;  %v291_v28 = vmul.f32 %v283_v23, %v271_v22  ;;  %v292_v29 = vmul.f32 %v287_v26, %v272_v21 }
 0x151   :  { %v293_v27 = vadd.f32 %v290_v25, %v289_v24 }
 0x153   :  { %v294_v30 = vadd.f32 %v293_v27, %v291_v28 }
 0x155   :  { %v295_v31 = vadd.f32 %v294_v30, %v292_v29 }
 0x157   :  { %v296_v32 = vrot.slane %v295_v31, 4 }
 0x159   :  { %v297_v33 = vadd.f32 %v296_v32, %v295_v31 }
 0x15b   :  { %v298_v34 = vrot.slane %v297_v33, 2 }
 0x15d   :  { %v299_v36 = vadd.f32 %v298_v34, %v297_v33 }
 0x15f   :  { %v300_v37 = vrot.slane %v299_v36, 1 }
 0x161   :  { %v301_v38 = vadd.f32 %v300_v37, %v299_v36 }
 0x163   :  { %v302_v40 = vmul.f32 %v301_v38, %v1475_v56  ;;  %v304_v41 = vmul.f32 %v301_v38, %v1482_v62  ;;  %v303_v42 = vmul.f32 %v1472_v54, %v301_v38  ;;  %v305_v51 = vmul.f32 %v1480_v60, %v301_v38 }
 0x165   :  { %v306_v53 = vadd.f32 %v302_v40, %v269_v19  ;;  %v308_v55 = vadd.f32 %v304_v41, %v271_v22  ;;  %v307_v57 = vadd.f32 %v303_v42, %v270_v20  ;;  %v309_v58 = vadd.f32 %v305_v51, %v272_v21  ;;  %v933_v21 = vld [vmem:[%s1584_s3 + $0x20] sm:$0xff] }
 0x166   :  { %1033 = vmatprep.mubr.msk.f32.mxu0 %vm130_vm0, %v933_v21 }
 0x167   :  { %v326_v59 = vmul.f32 %v312_v35, %v306_v53  ;;  %v327_v61 = vmul.f32 %v316_v52, %v307_v57  ;;  %v328_v0 = vmul.f32 %v320_v39, %v308_v55  ;;  %v329_v2 = vmul.f32 %v324_v63, %v309_v58  ;;  %v605_v63 = vpop.permute.xlu0 %604 }
 0x169   :  { %v330_v1 = vadd.f32 %v327_v61, %v326_v59  ;;  %v887_v59 = vld [vmem:[%s1588_s7 + $0x8] sm:$0xff]  ;;  %v609_v61 = vpop.permute.xlu1 %608 }
 0x16a   :  { %895 = vperm.xlu1 %1149, %v887_v59  }
 0x16b   :  { %v331_v3 = vadd.f32 %v330_v1, %v328_v0 }
 0x16d   :  { %v332_v4 = vadd.f32 %v331_v3, %v329_v2 }
 0x16f   :  { %v333_v5 = vrot.slane %v332_v4, 4 }
 0x171   :  { %v334_v6 = vadd.f32 %v333_v5, %v332_v4  ;;  %v617_v5 = vpop.permute.xlu1 %616 }
 0x173   :  { %v335_v7 = vrot.slane %v334_v6, 2 }
 0x175   :  { %v336_v8 = vadd.f32 %v335_v7, %v334_v6 }
 0x177   :  { %v337_v9 = vrot.slane %v336_v8, 1 }
 0x179   :  { %v338_v10 = vadd.f32 %v337_v9, %v336_v8  ;;  %v613_v8 = vpop.permute.xlu0 %612 }
 0x17b   :  { %v342_v11 = vmul.f32 %v1480_v60, %v338_v10  ;;  %v339_v12 = vmul.f32 %v338_v10, %v1475_v56  ;;  %v340_v13 = vmul.f32 %v1472_v54, %v338_v10  ;;  %v341_v14 = vmul.f32 %v338_v10, %v1482_v62 }
 0x17d   :  { %v346_v15 = vadd.f32 %v342_v11, %v309_v58  ;;  %v343_v16 = vadd.f32 %v339_v12, %v306_v53  ;;  %v344_v17 = vadd.f32 %v340_v13, %v307_v57  ;;  %v345_v18 = vadd.f32 %v341_v14, %v308_v55  ;;  %v720_v55 = vld [vmem:[#allocation7] sm:$0xff]  ;;  %v721_v57 = vld [vmem:[#allocation7 + $0x8] sm:$0xff] }
 0x17e   :  { %v886_v58 = vld [vmem:[%s1588_s7] sm:$0xff] }
 0x17f   :  { %v1115_v19 = vpack.c.bf16 %v344_v17, %v343_v16  ;;  %v1119_v20 = vpack.c.bf16 %v346_v15, %v345_v18  ;;  %890 = vperm.xlu0 %1148, %v886_v58   ;;  %v723_v16 = vld [vmem:[#allocation8 + $0x8] sm:$0xff] }
 0x212   :  { %v1021_v22 = vpop.f32.mrb[0].mxu1 }
 0x213   :  { %v459_v60 = vadd.f32 %v1021_v22, %v1462_v46  ;;  %v453_v56 = vpop.f32.mrb[1].mxu1  ;;  %v941_v46 = vld [vmem:[%s1584_s3 + $0x40] sm:$0xff] }
 0x214   :  { %v454_v54 = vadd.f32 %v453_v56, %v1458_v44  ;;  %v934_v44 = vld [vmem:[%s1584_s3 + $0x28] sm:$0xff]  ;;  %1047 = vmatprep.mubr.msk.f32.mxu1 %vm130_vm0, %v941_v46 }
 0x215   :  { %v473_v23 = vmax.f32 %v459_v60, 0.0  ;;  %v891_v60 = vpop.permute.xlu0 %890 }
 0x216   :  { %v472_v62 = vmax.f32 %v454_v54, 0.0  ;;  %v1024_v24 = vpop.f32.mrb[2].mxu1 }
 0x217   :  { %v469_v25 = vadd.f32 %v1024_v24, %v1460_v45  ;;  %v463_v26 = vpop.f32.mrb[3].mxu1  ;;  %v935_v45 = vld [vmem:[%s1584_s3 + $0x30] sm:$0xff] }
 0x218   :  { %v1091_v27 = vpack.c.bf16 %v473_v23, %v472_v62  ;;  %v464_v28 = vadd.f32 %v463_v26, %v1456_v43  ;;  %v936_v43 = vld [vmem:[%s1584_s3 + $0x38] sm:$0xff] }
 0x219   :  { %v475_v29 = vmax.f32 %v469_v25, 0.0 }
 0x21a   :  { %v474_v30 = vmax.f32 %v464_v28, 0.0  ;;  %1092 = vmatprep.subr.bf16.mxu0 %v1091_v27 }
 0x21b   :  { %1094 = vmatpush3.bf16.msra.mxu0 %v1091_v27 }
 0x21c   :  { %v1095_v31 = vpack.c.bf16 %v475_v29, %v474_v30 }
 0x21e   :  { %1096 = vmatprep.subr.bf16.mxu0 %v1095_v31 }
 0x21f   :  { %1098 = vmatpush3.bf16.msra.mxu0 %v1095_v31 }
 0x220   :  { %1116 = vmatprep.subr.bf16.mxu0 %v1115_v19 }
 0x222   :  { %1034 = vmatmul.mubr.msk.f32.vlgmr.msra.gmra.mrb[4].mxu0 %vm130_vm0, %v934_v44 }
 0x223   :  { %1118 = vmatpush3.bf16.msra.mxu0 %v1115_v19  ;;  %1036 = vmatprep.mubr.msk.f32.mxu0 %vm130_vm0, %v935_v45 }
 0x224   :  { %1120 = vmatprep.subr.bf16.mxu0 %v1119_v20 }
 0x226   :  { %1037 = vmatmul.mubr.msk.f32.gmra.mrb[6].mxu0 %vm130_vm0, %v936_v43 }
 0x227   :  { %1122 = vmatpush3.bf16.msra.mxu0 %v1119_v20  ;;  %1072 = vmatprep.mubr.msk.f32.mxu0 %vm130_vm0, %v720_v55  ;;  %v896_v20 = vpop.permute.xlu1 %895 }
 0x22a   :  { %1073 = vmatmul.mubr.msk.f32.vlgmr.msra.gmra.mrb[8].mxu0 %vm130_vm0, %v721_v57 }
 0x2f5   :  { %v1035_v32 = vpop.f32.mrb[4].mxu0 }
 0x2f6   :  { %v581_v33 = vadd.f32 %v1035_v32, %v1464_v47  ;;  %v575_v34 = vpop.f32.mrb[5].mxu0  ;;  %v942_v47 = vld [vmem:[%s1584_s3 + $0x48] sm:$0xff] }
 0x2f7   :  { %v576_v35 = vadd.f32 %v575_v34, %v1466_v48  ;;  %v943_v48 = vld [vmem:[%s1584_s3 + $0x50] sm:$0xff] }
 0x2f8   :  { %v595_v36 = vmax.f32 %v581_v33, 0.0 }
 0x2f9   :  { %v594_v37 = vmax.f32 %v576_v35, 0.0  ;;  %v1038_v38 = vpop.f32.mrb[6].mxu0 }
 0x2fa   :  { %v591_v39 = vadd.f32 %v1038_v38, %v1470_v50  ;;  %v585_v40 = vpop.f32.mrb[7].mxu0  ;;  %v722_v50 = vld [vmem:[#allocation8] sm:$0xff] }
 0x2fb   :  { %v1099_v41 = vpack.c.bf16 %v595_v36, %v594_v37  ;;  %v586_v42 = vadd.f32 %v585_v40, %v1468_v49  ;;  %v944_v49 = vld [vmem:[%s1584_s3 + $0x58] sm:$0xff]  ;;  %s1278_s3 = smov [#allocation10]  }
 0x2fc   :  { %v597_v51 = vmax.f32 %v591_v39, 0.0  ;;  %s907_s7 = sshll.u32 %s1278_s3, 4  ;;  %s908_s7 = int_to_ptr.vmem [resolvable:$true] %s907_s7 }
 0x2fd   :  { %v596_v52 = vmax.f32 %v586_v42, 0.0  ;;  %1100 = vmatprep.subr.bf16.mxu1 %v1099_v41  ;;  %v1074_v17 = vpop.f32.mrb[8].mxu0  ;;  %s1238_s25 = scalar_lea.vmem %s908_s7, 256  ;;  %p1243_p5 = scmp.lt.s32.totalorder %s908_s7, %s908_s7 }
 0x2fe   :  { %1102 = vmatpush3.bf16.msra.mxu1 %v1099_v41  ;;  %v877_v18 = vpop.f32.mrb[9].mxu0  ;;  %p1239_p4 = scmp.ne.s32.totalorder %s908_s7, %s1238_s25  ;;  %p1244_p6 = scmp.lt.s32.totalorder %s1238_s25, %s1238_s25 }
 0x2ff   :  { %v1103_v53 = vpack.c.bf16 %v597_v51, %v596_v52 }
 0x300   :  { %p1245_p7 = por %p1244_p6, %p1243_p5 }
 0x301   :  { %1104 = vmatprep.subr.bf16.mxu1 %v1103_v53 }
 0x302   :  { %1106 = vmatpush3.bf16.msra.mxu1 %v1103_v53  ;;  %p1246_p8 = pnand %p1245_p7, %p1239_p4 }
 0x305   :  { %1048 = vmatmul.mubr.msk.f32.vlgmr.msra.gmra.mrb[4].mxu1 %vm130_vm0, %v942_v47 }
 0x306   :  { %1050 = vmatprep.mubr.msk.f32.mxu1 %vm130_vm0, %v943_v48 }
 0x309   :  { %1051 = vmatmul.mubr.msk.f32.gmra.mrb[6].mxu1 %vm130_vm0, %v944_v49 }
 0x30a   :  { %1061 = vmatprep.mubr.msk.f32.mxu1 %vm130_vm0, %v722_v50 }
 0x3d8   :  { %v1049_v0 = vpop.f32.mrb[4].mxu1 }
 0x3d9   :  { %v703_v1 = vadd.f32 %v1049_v0, %v609_v61  ;;  %v697_v2 = vpop.f32.mrb[5].mxu1 }
 0x3da   :  { %v698_v3 = vadd.f32 %v697_v2, %v605_v63 }
 0x3db   :  { %v717_v4 = vmax.f32 %v703_v1, 0.0 }
 0x3dc   :  { %v716_v6 = vmax.f32 %v698_v3, 0.0  ;;  %v1052_v7 = vpop.f32.mrb[6].mxu1 }
 0x3dd   :  { %v713_v9 = vadd.f32 %v1052_v7, %v617_v5  ;;  %v707_v10 = vpop.f32.mrb[7].mxu1 }
 0x3de   :  { %v1107_v11 = vpack.c.bf16 %v717_v4, %v716_v6  ;;  %v708_v12 = vadd.f32 %v707_v10, %v613_v8 }
 0x3df   :  { %v719_v13 = vmax.f32 %v713_v9, 0.0 }
 0x3e0   :  { %v718_v14 = vmax.f32 %v708_v12, 0.0  ;;  %1108 = vmatprep.subr.bf16.mxu1 %v1107_v11 }
 0x3e1   :  { %1110 = vmatpush3.bf16.msra.mxu1 %v1107_v11 }
 0x3e2   :  { %v1111_v15 = vpack.c.bf16 %v719_v13, %v718_v14 }
 0x3e4   :  { %1112 = vmatprep.subr.bf16.mxu1 %v1111_v15 }
 0x3e5   :  { %1114 = vmatpush3.bf16.msra.mxu1 %v1111_v15 }
 0x3e8   :  { %1062 = vmatmul.mubr.msk.f32.vlgmr.msra.gmra.mrb[8].mxu1 %vm130_vm0, %v723_v16 }
 0x4bb   :  { %v1063_v19 = vpop.f32.mrb[8].mxu1 }
 0x4bc   :  { %v883_v21 = vadd.f32 %v1074_v17, %v1063_v19  ;;  %v796_v22 = vpop.f32.mrb[9].mxu1 }
 0x4bd   :  { %v878_v56 = vadd.f32 %v877_v18, %v796_v22 }
 0x4be   :  { %v899_v54 = vadd.f32 %v896_v20, %v883_v21 }
 0x4bf   :  { %v898_v23 = vadd.f32 %v891_v60, %v878_v56 }
 0x4c0   :  { %901 = vst [vmem:[#allocation10 + $0x8] sm:$0xff] %v899_v54 }
 0x4c1   :  { %900 = vst [vmem:[#allocation10] sm:$0xff] %v898_v23 }
 0x4c2   :  { %1249 = shalt.err (!%p1246_p8)
}
 0x4c3   :  { %s1250_s29 = scalar_lea.hbm %s1589_s8, 256 }
 0x4c4   :  { %p1251_p9 = scmp.ne.s32.totalorder %s1589_s8, %s1250_s29  ;;  %p1254_p10 = scmp.lt.u32.totalorder %s1250_s29, %s1589_s8 }
 0x4c6   :  { %p1256_p11 = pnand %p1254_p10, %p1251_p9 }
 0x4c8   :  { %1259 = shalt.err (!%p1256_p11)
}
 0x4c9   :  { %913 = dma.vmem_to_hbm [thread:$0]  %s908_s7, 256, %s1589_s8, [#allocation4], %s1270_s17, %s1270_s17, %s1271_s18  }
 0x4ca   :  { %1266 = dma.done.wait [#allocation4], 256  }
 0x4cb   :  { %1267 = vsyncadd [#allocation4], 4294967040 }
 0x4cc   :  { %917 = vsyncpa [#allocation3], 1 }
 0x4cd   :  { %918 = vsyncpa [#allocation6], 1 }
 0x4ce   :  { %919 = vsyncpa [#allocation9], 1 }
 0x4cf   :  { %920 = vsyncpa [#allocation4], 1 }

</bundles_post_ra>
